<compile_context>
chip_gen: v7x
topology: tpu7x:2x2x1
jax: 0.10.0
libtpu: 0.0.40
codegen_flags: <defaults>
</compile_context>

<pallas_src>
import functools

import jax
import jax.numpy as jnp
from jax import lax
from jax.experimental import pallas as pl
from jax.experimental.pallas import tpu as pltpu


def _round_up(n, m):
    return (n + m - 1) // m * m


def _ff_shared_kernel(x_ref, w_ref, bi_ref, bo_ref, o_ref):
    # x_ref: (tm, Dp)   w_ref: (Hp, Dp)   bi_ref: (1, Hp) f32   bo_ref: (1, Dp) f32
    x = x_ref[...]
    w = w_ref[...]

    # First linear: x @ W.T — contract directly on W's last dim (no transposed copy of W).
    h = lax.dot_general(
        x, w, dimension_numbers=(((1,), (1,)), ((), ())),
        preferred_element_type=jnp.float32,
    )
    h = jnp.maximum(h + bi_ref[...], 0.0)  # bias add + relu in f32
    # TODO(synk): dropout with p>0 in training mode not implemented (p=0 / eval -> identity)

    # Second linear (shared weight, un-transposed): h @ W + b_o.
    h = h.astype(w.dtype)  # keep MXU operands in the weight's native dtype (bf16-friendly)
    out = jnp.dot(h, w, preferred_element_type=jnp.float32) + bo_ref[...]
    o_ref[...] = out.astype(o_ref.dtype)


def _run_pallas(x2p, w_p, bi2, bo2, *, tm, Mp, Dp, Hp, out_dtype,
                single_buffer_consts, vmem_limit_bytes, cost):
    if single_buffer_consts:
        def const_spec(shape):
            # Loop-invariant operands: single-buffer to halve their VMEM footprint.
            return pl.BlockSpec(shape, lambda i: (0, 0), pipeline_mode=pl.Buffered(1))
    else:
        def const_spec(shape):
            return pl.BlockSpec(shape, lambda i: (0, 0))

    return pl.pallas_call(
        _ff_shared_kernel,
        out_shape=jax.ShapeDtypeStruct((Mp, Dp), out_dtype),
        grid_spec=pltpu.PrefetchScalarGridSpec(
            num_scalar_prefetch=0,
            grid=(Mp // tm,),
            in_specs=[
                pl.BlockSpec((tm, Dp), lambda i: (i, 0)),   # x row tile
                const_spec((Hp, Dp)),                       # shared weight (whole, resident)
                const_spec((1, Hp)),                        # bias_i
                const_spec((1, Dp)),                        # bias_o
            ],
            out_specs=pl.BlockSpec((tm, Dp), lambda i: (i, 0)),
        ),
        compiler_params=pltpu.CompilerParams(
            dimension_semantics=("parallel",),
            vmem_limit_bytes=vmem_limit_bytes,
        ),
        cost_estimate=cost,
    )(x2p, w_p, bi2, bo2)


def position_wise_ff_shared(x, weight, bias_i, bias_o, *, tm=256):
    """x: (..., D); weight: (H, D); bias_i: (H,); bias_o: (D,)."""
    orig_shape = x.shape
    D = orig_shape[-1]
    H, D_w = weight.shape
    assert D_w == D, "shared-weight FF requires output_size == input_size"

    x2 = x.reshape(-1, D)
    M = x2.shape[0]

    # Lane-dense padding: last dims to multiples of 128; rows to a tile multiple.
    Dp = _round_up(D, 128)
    Hp = _round_up(H, 128)
    tm = min(tm, _round_up(M, 8))       # don't over-pad tiny inputs; keep sublane multiple of 8
    Mp = _round_up(M, tm)

    x2p = x2
    if (Mp, Dp) != (M, D):
        x2p = jnp.pad(x2, ((0, Mp - M), (0, Dp - D)))
    w_p = weight
    if (Hp, Dp) != (H, D):
        w_p = jnp.pad(weight, ((0, Hp - H), (0, Dp - D)))
    bi2 = jnp.pad(bias_i.astype(jnp.float32), (0, Hp - H)).reshape(1, Hp)
    bo2 = jnp.pad(bias_o.astype(jnp.float32), (0, Dp - D)).reshape(1, Dp)

    xb = x.dtype.itemsize
    wb = weight.dtype.itemsize

    # Advisory cost estimate for XLA's scheduler (two (Mp, Dp) x (Dp/Hp) matmuls).
    cost = pl.CostEstimate(
        flops=4 * Mp * Dp * Hp,
        transcendentals=0,
        bytes_accessed=2 * Mp * Dp * xb + Hp * Dp * wb + 4 * (Hp + Dp),
    )

    # VMEM budget: weight (allow 2x for the double-buffered fallback) + double-buffered
    # x/out tiles + f32 hidden intermediate + biases, with ~1.5x headroom.
    vmem_needed = (2 * Hp * Dp * wb
                   + 2 * tm * Dp * xb            # x tiles
                   + 2 * tm * Dp * xb            # out tiles
                   + tm * Hp * 4                 # f32 hidden
                   + 4 * (Hp + Dp))
    vmem_limit = int(min(max(vmem_needed * 3 // 2, 32 * 1024 * 1024),
                         100 * 1024 * 1024))

    run = functools.partial(
        _run_pallas, x2p, w_p, bi2, bo2,
        tm=tm, Mp=Mp, Dp=Dp, Hp=Hp, out_dtype=x.dtype,
        vmem_limit_bytes=vmem_limit, cost=cost)
    try:
        out = run(single_buffer_consts=True)
    except Exception:
        # pl.Buffered(1) rejected on this jax build -> fall back to default buffering.
        out = run(single_buffer_consts=False)

    return out[:M, :D].reshape(orig_shape)


def init_params(key, input_size, hidden_size):
    # xavier_uniform_ on weight (hidden_size, input_size).
    bound = (6.0 / (input_size + hidden_size)) ** 0.5
    weight = jax.random.uniform(
        key, (hidden_size, input_size), jnp.float32, minval=-bound, maxval=bound
    )
    bias_i = jnp.zeros((hidden_size,), jnp.float32)
    bias_o = jnp.zeros((input_size,), jnp.float32)
    return weight, bias_i, bias_o


if __name__ == "__main__":
    key = jax.random.PRNGKey(0)
    k_w, k_x = jax.random.split(key)

    batch, seq = 2, 8
    input_size, hidden_size = 32, 64  # output_size == input_size (asserted in module)

    weight, bias_i, bias_o = init_params(k_w, input_size, hidden_size)
    # Non-zero biases so the bias path is actually exercised.
    k_bi, k_bo = jax.random.split(jax.random.PRNGKey(2))
    bias_i = 0.1 * jax.random.normal(k_bi, (hidden_size,), jnp.float32)
    bias_o = 0.1 * jax.random.normal(k_bo, (input_size,), jnp.float32)

    x = jax.random.normal(k_x, (batch, seq, input_size), jnp.float32)

    out = position_wise_ff_shared(x, weight, bias_i, bias_o)
    out = jax.block_until_ready(out)

    # Reference (same math as the PyTorch forward in eval mode).
    ref = jnp.maximum(x @ weight.T + bias_i, 0.0) @ weight + bias_o
    assert out.shape == x.shape
    assert jnp.allclose(out, ref, atol=1e-5, rtol=1e-5), "mismatch vs reference"

    # Ragged row count (M = 15) exercises the row/lane padding path.
    x2 = jax.random.normal(jax.random.PRNGKey(1), (3, 5, input_size), jnp.float32)
    out2 = jax.block_until_ready(position_wise_ff_shared(x2, weight, bias_i, bias_o))
    ref2 = jnp.maximum(x2 @ weight.T + bias_i, 0.0) @ weight + bias_o
    assert jnp.allclose(out2, ref2, atol=1e-5, rtol=1e-5), "mismatch vs reference (ragged)"

    print("KERNEL_OK")
</pallas_src>

<mosaic_0001>
module attributes {stable_mosaic.version = 11 : i64} {
  func.func @_ff_shared_kernel(%arg0: i32, %arg1: memref<16x128xf32, #tpu.memory_space<vmem>>, %arg2: memref<128x128xf32, #tpu.memory_space<vmem>>, %arg3: memref<1x128xf32, #tpu.memory_space<vmem>>, %arg4: memref<1x128xf32, #tpu.memory_space<vmem>>, %arg5: memref<16x128xf32, #tpu.memory_space<vmem>>) attributes {dimension_semantics = [#tpu.dimension_semantics<parallel>], iteration_bounds = array<i64: 1>, scalar_prefetch = 0 : i64, scratch_operands = 0 : i64, tpu.core_type = #tpu.core_type<tc>, window_params = [{transform_indices = @transform_0, window_bounds = array<i64: 16, 128>}, {pipeline_mode = #tpu.pipeline_mode<synchronous>, transform_indices = @transform_1, window_bounds = array<i64: 128, 128>}, {pipeline_mode = #tpu.pipeline_mode<synchronous>, transform_indices = @transform_2, window_bounds = array<i64: 1, 128>}, {pipeline_mode = #tpu.pipeline_mode<synchronous>, transform_indices = @transform_3, window_bounds = array<i64: 1, 128>}, {transform_indices = @transform_4, window_bounds = array<i64: 16, 128>}]} {
    %c0 = arith.constant 0 : index
    %c0_0 = arith.constant 0 : index
    %0 = vector.load %arg1[%c0, %c0_0] : memref<16x128xf32, #tpu.memory_space<vmem>>, vector<16x128xf32>
    %c0_1 = arith.constant 0 : index
    %c0_2 = arith.constant 0 : index
    %1 = vector.load %arg2[%c0_1, %c0_2] : memref<128x128xf32, #tpu.memory_space<vmem>>, vector<128x128xf32>
    %cst = arith.constant dense<0.000000e+00> : vector<16x128xf32>
    %2 = tpu.matmul %0, %1, %cst {dimension_numbers = #tpu.dot_dimension_numbers<[1], [1], [0], [0], [0, 0, 1, 0], [], []>} : vector<16x128xf32>, vector<128x128xf32>, vector<16x128xf32> -> vector<16x128xf32>
    %c0_3 = arith.constant 0 : index
    %c0_4 = arith.constant 0 : index
    %3 = vector.load %arg3[%c0_3, %c0_4] : memref<1x128xf32, #tpu.memory_space<vmem>>, vector<1x128xf32>
    %4 = vector.broadcast %3 : vector<1x128xf32> to vector<16x128xf32>
    %5 = arith.addf %2, %4 : vector<16x128xf32>
    %cst_5 = arith.constant 0.000000e+00 : f32
    %6 = vector.broadcast %cst_5 : f32 to vector<16x128xf32>
    %7 = arith.maximumf %5, %6 : vector<16x128xf32>
    %cst_6 = arith.constant dense<0.000000e+00> : vector<16x128xf32>
    %8 = tpu.matmul %7, %1, %cst_6 {dimension_numbers = #tpu.dot_dimension_numbers<[1], [0], [0], [1], [0, 0, 1, 1], [], []>} : vector<16x128xf32>, vector<128x128xf32>, vector<16x128xf32> -> vector<16x128xf32>
    %c0_7 = arith.constant 0 : index
    %c0_8 = arith.constant 0 : index
    %9 = vector.load %arg4[%c0_7, %c0_8] : memref<1x128xf32, #tpu.memory_space<vmem>>, vector<1x128xf32>
    %10 = vector.broadcast %9 : vector<1x128xf32> to vector<16x128xf32>
    %11 = arith.addf %8, %10 : vector<16x128xf32>
    %c0_9 = arith.constant 0 : index
    %c0_10 = arith.constant 0 : index
    %12 = vector.load %arg5[%c0_9, %c0_10] : memref<16x128xf32, #tpu.memory_space<vmem>>, vector<16x128xf32>
    tpu.vector_store %arg5[%c0_9, %c0_10], %11 {strides = array<i32>} : memref<16x128xf32, #tpu.memory_space<vmem>>, vector<16x128xf32>,
    return
  }
  func.func @transform_0(%arg0: i32) -> (i32, i32) {
    %c0_i32 = arith.constant 0 : i32
    %c0_i32_0 = arith.constant 0 : i32
    return %arg0, %c0_i32 : i32, i32
  }
  func.func @transform_1(%arg0: i32) -> (i32, i32) {
    %c0_i32 = arith.constant 0 : i32
    %c0_i32_0 = arith.constant 0 : i32
    %c0_i32_1 = arith.constant 0 : i32
    return %c0_i32, %c0_i32_0 : i32, i32
  }
  func.func @transform_2(%arg0: i32) -> (i32, i32) {
    %c0_i32 = arith.constant 0 : i32
    %c0_i32_0 = arith.constant 0 : i32
    %c0_i32_1 = arith.constant 0 : i32
    return %c0_i32, %c0_i32_0 : i32, i32
  }
  func.func @transform_3(%arg0: i32) -> (i32, i32) {
    %c0_i32 = arith.constant 0 : i32
    %c0_i32_0 = arith.constant 0 : i32
    %c0_i32_1 = arith.constant 0 : i32
    return %c0_i32, %c0_i32_0 : i32, i32
  }
  func.func @transform_4(%arg0: i32) -> (i32, i32) {
    %c0_i32 = arith.constant 0 : i32
    %c0_i32_0 = arith.constant 0 : i32
    return %arg0, %c0_i32 : i32, i32
  }
}

module attributes {stable_mosaic.version = 11 : i64} {
  func.func @_ff_shared_kernel(%arg0: i32, %arg1: memref<16x128xf32, #tpu.memory_space<vmem>>, %arg2: memref<128x128xf32, #tpu.memory_space<vmem>>, %arg3: memref<1x128xf32, #tpu.memory_space<vmem>>, %arg4: memref<1x128xf32, #tpu.memory_space<vmem>>, %arg5: memref<16x128xf32, #tpu.memory_space<vmem>>) attributes {dimension_semantics = [#tpu.dimension_semantics<parallel>], iteration_bounds = array<i64: 1>, scalar_prefetch = 0 : i64, scratch_operands = 0 : i64, tpu.core_type = #tpu.core_type<tc>, window_params = [{transform_indices = @transform_0, window_bounds = array<i64: 16, 128>}, {pipeline_mode = #tpu.pipeline_mode<synchronous>, transform_indices = @transform_1, window_bounds = array<i64: 128, 128>}, {pipeline_mode = #tpu.pipeline_mode<synchronous>, transform_indices = @transform_2, window_bounds = array<i64: 1, 128>}, {pipeline_mode = #tpu.pipeline_mode<synchronous>, transform_indices = @transform_3, window_bounds = array<i64: 1, 128>}, {transform_indices = @transform_4, window_bounds = array<i64: 16, 128>}]} {
    %c0 = arith.constant 0 : index
    %c0_0 = arith.constant 0 : index
    %0 = vector.load %arg1[%c0, %c0_0] : memref<16x128xf32, #tpu.memory_space<vmem>>, vector<16x128xf32>
    %c0_1 = arith.constant 0 : index
    %c0_2 = arith.constant 0 : index
    %1 = vector.load %arg2[%c0_1, %c0_2] : memref<128x128xf32, #tpu.memory_space<vmem>>, vector<128x128xf32>
    %cst = arith.constant dense<0.000000e+00> : vector<16x128xf32>
    %2 = tpu.matmul %0, %1, %cst {dimension_numbers = #tpu.dot_dimension_numbers<[1], [1], [0], [0], [0, 0, 1, 0], [], []>} : vector<16x128xf32>, vector<128x128xf32>, vector<16x128xf32> -> vector<16x128xf32>
    %c0_3 = arith.constant 0 : index
    %c0_4 = arith.constant 0 : index
    %3 = vector.load %arg3[%c0_3, %c0_4] : memref<1x128xf32, #tpu.memory_space<vmem>>, vector<1x128xf32>
    %4 = vector.broadcast %3 : vector<1x128xf32> to vector<16x128xf32>
    %5 = arith.addf %2, %4 : vector<16x128xf32>
    %cst_5 = arith.constant 0.000000e+00 : f32
    %6 = vector.broadcast %cst_5 : f32 to vector<16x128xf32>
    %7 = arith.maximumf %5, %6 : vector<16x128xf32>
    %cst_6 = arith.constant dense<0.000000e+00> : vector<16x128xf32>
    %8 = tpu.matmul %7, %1, %cst_6 {dimension_numbers = #tpu.dot_dimension_numbers<[1], [0], [0], [1], [0, 0, 1, 1], [], []>} : vector<16x128xf32>, vector<128x128xf32>, vector<16x128xf32> -> vector<16x128xf32>
    %c0_7 = arith.constant 0 : index
    %c0_8 = arith.constant 0 : index
    %9 = vector.load %arg4[%c0_7, %c0_8] : memref<1x128xf32, #tpu.memory_space<vmem>>, vector<1x128xf32>
    %10 = vector.broadcast %9 : vector<1x128xf32> to vector<16x128xf32>
    %11 = arith.addf %8, %10 : vector<16x128xf32>
    %c0_9 = arith.constant 0 : index
    %c0_10 = arith.constant 0 : index
    %12 = vector.load %arg5[%c0_9, %c0_10] : memref<16x128xf32, #tpu.memory_space<vmem>>, vector<16x128xf32>
    tpu.vector_store %arg5[%c0_9, %c0_10], %11 {strides = array<i32>} : memref<16x128xf32, #tpu.memory_space<vmem>>, vector<16x128xf32>,
    return
  }
  func.func @transform_0(%arg0: i32) -> (i32, i32) {
    %c0_i32 = arith.constant 0 : i32
    %c0_i32_0 = arith.constant 0 : i32
    return %arg0, %c0_i32 : i32, i32
  }
  func.func @transform_1(%arg0: i32) -> (i32, i32) {
    %c0_i32 = arith.constant 0 : i32
    %c0_i32_0 = arith.constant 0 : i32
    %c0_i32_1 = arith.constant 0 : i32
    return %c0_i32, %c0_i32_0 : i32, i32
  }
  func.func @transform_2(%arg0: i32) -> (i32, i32) {
    %c0_i32 = arith.constant 0 : i32
    %c0_i32_0 = arith.constant 0 : i32
    %c0_i32_1 = arith.constant 0 : i32
    return %c0_i32, %c0_i32_0 : i32, i32
  }
  func.func @transform_3(%arg0: i32) -> (i32, i32) {
    %c0_i32 = arith.constant 0 : i32
    %c0_i32_0 = arith.constant 0 : i32
    %c0_i32_1 = arith.constant 0 : i32
    return %c0_i32, %c0_i32_0 : i32, i32
  }
  func.func @transform_4(%arg0: i32) -> (i32, i32) {
    %c0_i32 = arith.constant 0 : i32
    %c0_i32_0 = arith.constant 0 : i32
    return %arg0, %c0_i32 : i32, i32
  }
}

</mosaic_0001>

<bundles_post_ra>
// kernel: tpu_custom_call.1
= control target key start
LH: loop header
LB: loop body
LE: loop exit
PB: predicated region body
PF: predicated region fallthrough
CT: control target
= control target key end

     0   :  { %9 = vsyncpa [#allocation3], 0  ;;  %s580_s0 = inlined_call_operand.hbm [shape: f32[16,128], index: 0, kind: input, shape index: {}]   ;;  %s581_s1 = inlined_call_operand.hbm [shape: f32[128,128], index: 1, kind: input, shape index: {}]   ;;  %s582_s2 = inlined_call_operand.vmem [shape: f32[1,128], index: 2, kind: input, shape index: {}]   ;;  %s583_s3 = inlined_call_operand.vmem [shape: f32[1,128], index: 3, kind: input, shape index: {}]   ;;  %s584_s4 = inlined_call_operand.hbm [shape: f32[16,128], index: 4, kind: output, shape index: {}]  }
   0x1   :  { %10 = vsyncpa [#allocation6], 0 }
   0x2   :  { %11 = vsyncpa [#allocation4], 0  ;;  %s499_s15 = smov [#allocation2]   ;;  %s427_s19 = scalar_lea.hbm %s580_s0, 256 }
   0x3   :  { %s17_s16 = sshll.u32 %s499_s15, 4  ;;  %p428_p0 = scmp.ne.s32.totalorder %s580_s0, %s427_s19  ;;  %s18_s16 = int_to_ptr.vmem [resolvable:$true] %s17_s16 }
   0x4   :  { %p431_p1 = scmp.lt.u32.totalorder %s427_s19, %s580_s0 }
   0x6   :  { %p433_p2 = pnand %p431_p1, %p428_p0 }
   0x8   :  { %436 = shalt.err (!%p433_p2)
}
   0x9   :  { %s437_s24 = scalar_lea.vmem %s18_s16, 256  ;;  %p442_p4 = scmp.lt.s32.totalorder %s18_s16, %s18_s16 }
   0xa   :  { %p438_p3 = scmp.ne.s32.totalorder %s18_s16, %s437_s24  ;;  %p443_p5 = scmp.lt.s32.totalorder %s437_s24, %s437_s24 }
   0xc   :  { %p444_p6 = por %p443_p5, %p442_p4 }
   0xe   :  { %p445_p7 = pnand %p444_p6, %p438_p3 }
  0x10   :  { %448 = shalt.err (!%p445_p7)
}
  0x11   :  { %s500_s25 = smov 128   ;;  %s501_s26 = smov 8  }
  0x12   :  { %23 = dma.hbm_to_vmem [thread:$0]  %s580_s0, 256, %s18_s16, [#allocation3], %s500_s25, %s500_s25, %s501_s26  }
  0x13   :  { %s502_s29 = smov [#allocation5]   ;;  %s449_s7 = scalar_lea.hbm %s581_s1, 2048 }
  0x14   :  { %s29_s30 = sshll.u32 %s502_s29, 4  ;;  %p450_p8 = scmp.ne.s32.totalorder %s581_s1, %s449_s7  ;;  %s30_s30 = int_to_ptr.vmem [resolvable:$true] %s29_s30 }
  0x15   :  { %p453_p9 = scmp.lt.u32.totalorder %s449_s7, %s581_s1 }
  0x17   :  { %p455_p10 = pnand %p453_p9, %p450_p8 }
  0x19   :  { %458 = shalt.err (!%p455_p10)
}
  0x1a   :  { %s459_s12 = scalar_lea.vmem %s30_s30, 2048  ;;  %p464_p12 = scmp.lt.s32.totalorder %s30_s30, %s30_s30 }
  0x1b   :  { %p460_p11 = scmp.ne.s32.totalorder %s30_s30, %s459_s12  ;;  %p465_p13 = scmp.lt.s32.totalorder %s459_s12, %s459_s12 }
  0x1d   :  { %p466_p0 = por %p465_p13, %p464_p12 }
  0x1f   :  { %p467_p1 = pnand %p466_p0, %p460_p11 }
  0x21   :  { %470 = shalt.err (!%p467_p1)
}
  0x22   :  { %35 = dma.hbm_to_vmem [thread:$0]  %s581_s1, 2048, %s30_s30, [#allocation6], %s500_s25, %s500_s25, %s501_s26  }
  0x23   :  { %493 = dma.done.wait [#allocation3], 256  }
  0x24   :  { %494 = vsyncadd [#allocation3], 4294967040 }
  0x25   :  { %495 = dma.done.wait [#allocation6], 2048  }
  0x26   :  { %496 = vsyncadd [#allocation6], 4294965248  ;;  %v48_v0 = vld [vmem:[#allocation5] sm:$0xff]  ;;  %v49_v1 = vld [vmem:[#allocation5 + $0x8] sm:$0xff]  ;;  %s503_s17 = smov [#allocation7]  }
  0x27   :  { %v50_v2 = vld [vmem:[#allocation5 + $0x10] sm:$0xff]  ;;  %v358_v3 = vpack.c.bf16 %v49_v1, %v48_v0  ;;  %v51_v4 = vld [vmem:[#allocation5 + $0x18] sm:$0xff]  ;;  %v52_v6 = vld [vmem:[#allocation5 + $0x20] sm:$0xff]  ;;  %s237_s18 = sshll.u32 %s503_s17, 4  ;;  %s238_s18 = int_to_ptr.vmem [resolvable:$true] %s237_s18 }
  0x28   :  { %v362_v5 = vpack.c.bf16 %v51_v4, %v50_v2  ;;  %v53_v7 = vld [vmem:[#allocation5 + $0x28] sm:$0xff]  ;;  %v46_v8 = vld [vmem:[#allocation2] sm:$0xff]  ;;  %v55_v11 = vld [vmem:[#allocation5 + $0x38] sm:$0xff]  ;;  %p476_p3 = scmp.lt.s32.totalorder %s238_s18, %s238_s18 }
  0x29   :  { %359 = vmatprep.subr.bf16.mxu0 %v358_v3  ;;  %391 = vmatprep.subr.bf16.mxu1 %v358_v3  ;;  %v366_v9 = vpack.c.bf16 %v53_v7, %v52_v6  ;;  %v54_v10 = vld [vmem:[#allocation5 + $0x30] sm:$0xff]  ;;  %v56_v13 = vld [vmem:[#allocation5 + $0x40] sm:$0xff]  ;;  %v57_v14 = vld [vmem:[#allocation5 + $0x48] sm:$0xff] }
  0x2a   :  { %361 = vmatpush3.bf16.xpose.msra.mxu0 %v358_v3  ;;  %393 = vmatpush3.bf16.msra.mxu1 %v358_v3  ;;  %v370_v12 = vpack.c.bf16 %v55_v11, %v54_v10  ;;  %v374_v15 = vpack.c.bf16 %v57_v14, %v56_v13  ;;  %v58_v16 = vld [vmem:[#allocation5 + $0x50] sm:$0xff]  ;;  %v59_v17 = vld [vmem:[#allocation5 + $0x58] sm:$0xff]  ;;  %v60_v19 = vld [vmem:[#allocation5 + $0x60] sm:$0xff] }
  0x2b   :  { %363 = vmatprep.subr.bf16.mxu0 %v362_v5  ;;  %395 = vmatprep.subr.bf16.mxu1 %v362_v5  ;;  %v378_v18 = vpack.c.bf16 %v59_v17, %v58_v16  ;;  %v61_v20 = vld [vmem:[#allocation5 + $0x68] sm:$0xff]  ;;  %v62_v22 = vld [vmem:[#allocation5 + $0x70] sm:$0xff]  ;;  %v63_v23 = vld [vmem:[#allocation5 + $0x78] sm:$0xff] }
  0x2c   :  { %320 = vmatprep.mubr.f32.mxu0 %v46_v8  ;;  %v382_v21 = vpack.c.bf16 %v61_v20, %v60_v19  ;;  %v386_v24 = vpack.c.bf16 %v63_v23, %v62_v22  ;;  %v47_v25 = vld [vmem:[#allocation2 + $0x8] sm:$0xff]  ;;  %v250_v26 = vld [vmem:[%s582_s2] ss:$0 sm:$0xff]  ;;  %s471_s2 = scalar_lea.vmem %s238_s18, 256 }
  0x2d   :  { %v251_v33 = vld [vmem:[%s583_s3] ss:$0 sm:$0xff]  ;;  %p472_p2 = scmp.ne.s32.totalorder %s238_s18, %s471_s2  ;;  %p477_p4 = scmp.lt.s32.totalorder %s471_s2, %s471_s2 }
  0x2e   :  { %397 = vmatpush3.bf16.msra.mxu1 %v362_v5 }
  0x2f   :  { %399 = vmatprep.subr.bf16.mxu1 %v366_v9  ;;  %p478_p5 = por %p477_p4, %p476_p3 }
  0x31   :  { %p479_p6 = pnand %p478_p5, %p472_p2 }
  0x32   :  { %365 = vmatpush3.bf16.xpose.msra.mxu0 %v362_v5  ;;  %401 = vmatpush3.bf16.msra.mxu1 %v366_v9 }
  0x33   :  { %367 = vmatprep.subr.bf16.mxu0 %v366_v9  ;;  %403 = vmatprep.subr.bf16.mxu1 %v370_v12 }
  0x36   :  { %405 = vmatpush3.bf16.msra.mxu1 %v370_v12 }
  0x37   :  { %407 = vmatprep.subr.bf16.mxu1 %v374_v15 }
  0x3a   :  { %369 = vmatpush3.bf16.xpose.msra.mxu0 %v366_v9  ;;  %409 = vmatpush3.bf16.msra.mxu1 %v374_v15 }
  0x3b   :  { %371 = vmatprep.subr.bf16.mxu0 %v370_v12  ;;  %411 = vmatprep.subr.bf16.mxu1 %v378_v18 }
  0x3e   :  { %413 = vmatpush3.bf16.msra.mxu1 %v378_v18 }
  0x3f   :  { %415 = vmatprep.subr.bf16.mxu1 %v382_v21 }
  0x42   :  { %373 = vmatpush3.bf16.xpose.msra.mxu0 %v370_v12  ;;  %417 = vmatpush3.bf16.msra.mxu1 %v382_v21 }
  0x43   :  { %375 = vmatprep.subr.bf16.mxu0 %v374_v15  ;;  %419 = vmatprep.subr.bf16.mxu1 %v386_v24 }
  0x46   :  { %421 = vmatpush3.bf16.msra.mxu1 %v386_v24 }
  0x4a   :  { %377 = vmatpush3.bf16.xpose.msra.mxu0 %v374_v15 }
  0x4b   :  { %379 = vmatprep.subr.bf16.mxu0 %v378_v18 }
  0x52   :  { %381 = vmatpush3.bf16.xpose.msra.mxu0 %v378_v18 }
  0x53   :  { %383 = vmatprep.subr.bf16.mxu0 %v382_v21 }
  0x5a   :  { %385 = vmatpush3.bf16.xpose.msra.mxu0 %v382_v21 }
  0x5b   :  { %387 = vmatprep.subr.bf16.mxu0 %v386_v24 }
  0x62   :  { %389 = vmatpush3.bf16.xpose.msra.mxu0 %v386_v24 }
  0x69   :  { %321 = vmatmul.mubr.f32.vlgmr.msra.gmra.mrb[0].mxu0 %v47_v25 }
 0x13c   :  { %v322_v27 = vpop.f32.mrb[0].mxu0 }
 0x13d   :  { %v143_v28 = vadd.f32 %v322_v27, %v250_v26  ;;  %v137_v29 = vpop.f32.mrb[1].mxu0 }
 0x13e   :  { %v138_v30 = vadd.f32 %v250_v26, %v137_v29 }
 0x13f   :  { %v147_v32 = vmax.f32 %v143_v28, 0.0 }
 0x140   :  { %v146_v31 = vmax.f32 %v138_v30, 0.0 }
 0x142   :  { %355 = vmatprep.mubr.f32.mxu1 %v146_v31 }
 0x143   :  { %356 = vmatmul.mubr.f32.vlgmr.msra.gmra.mrb[0].mxu1 %v147_v32 }
 0x216   :  { %v357_v34 = vpop.f32.mrb[0].mxu1 }
 0x217   :  { %v227_v35 = vadd.f32 %v357_v34, %v251_v33  ;;  %v221_v36 = vpop.f32.mrb[1].mxu1 }
 0x218   :  { %v222_v37 = vadd.f32 %v251_v33, %v221_v36 }
 0x219   :  { %231 = vst [vmem:[#allocation7 + $0x8] sm:$0xff] %v227_v35 }
 0x21a   :  { %230 = vst [vmem:[#allocation7] sm:$0xff] %v222_v37 }
 0x21b   :  { %482 = shalt.err (!%p479_p6)
}
 0x21c   :  { %s483_s3 = scalar_lea.hbm %s584_s4, 256 }
 0x21d   :  { %p484_p7 = scmp.ne.s32.totalorder %s584_s4, %s483_s3  ;;  %p487_p8 = scmp.lt.u32.totalorder %s483_s3, %s584_s4 }
 0x21f   :  { %p489_p9 = pnand %p487_p8, %p484_p7 }
 0x221   :  { %492 = shalt.err (!%p489_p9)
}
 0x222   :  { %243 = dma.vmem_to_hbm [thread:$0]  %s238_s18, 256, %s584_s4, [#allocation4], %s500_s25, %s500_s25, %s501_s26  }
 0x223   :  { %497 = dma.done.wait [#allocation4], 256  }
 0x224   :  { %498 = vsyncadd [#allocation4], 4294967040 }
 0x225   :  { %247 = vsyncpa [#allocation3], 1 }
 0x226   :  { %248 = vsyncpa [#allocation6], 1 }
 0x227   :  { %249 = vsyncpa [#allocation4], 1 }

// kernel: tpu_custom_call.1
= control target key start
LH: loop header
LB: loop body
LE: loop exit
PB: predicated region body
PF: predicated region fallthrough
CT: control target
= control target key end

     0   :  { %9 = vsyncpa [#allocation3], 0  ;;  %s580_s0 = inlined_call_operand.hbm [shape: f32[16,128], index: 0, kind: input, shape index: {}]   ;;  %s581_s1 = inlined_call_operand.hbm [shape: f32[128,128], index: 1, kind: input, shape index: {}]   ;;  %s582_s2 = inlined_call_operand.vmem [shape: f32[1,128], index: 2, kind: input, shape index: {}]   ;;  %s583_s3 = inlined_call_operand.vmem [shape: f32[1,128], index: 3, kind: input, shape index: {}]   ;;  %s584_s4 = inlined_call_operand.hbm [shape: f32[16,128], index: 4, kind: output, shape index: {}]  }
   0x1   :  { %10 = vsyncpa [#allocation6], 0 }
   0x2   :  { %11 = vsyncpa [#allocation4], 0  ;;  %s499_s15 = smov [#allocation2]   ;;  %s427_s19 = scalar_lea.hbm %s580_s0, 256 }
   0x3   :  { %s17_s16 = sshll.u32 %s499_s15, 4  ;;  %p428_p0 = scmp.ne.s32.totalorder %s580_s0, %s427_s19  ;;  %s18_s16 = int_to_ptr.vmem [resolvable:$true] %s17_s16 }
   0x4   :  { %p431_p1 = scmp.lt.u32.totalorder %s427_s19, %s580_s0 }
   0x6   :  { %p433_p2 = pnand %p431_p1, %p428_p0 }
   0x8   :  { %436 = shalt.err (!%p433_p2)
}
   0x9   :  { %s437_s24 = scalar_lea.vmem %s18_s16, 256  ;;  %p442_p4 = scmp.lt.s32.totalorder %s18_s16, %s18_s16 }
   0xa   :  { %p438_p3 = scmp.ne.s32.totalorder %s18_s16, %s437_s24  ;;  %p443_p5 = scmp.lt.s32.totalorder %s437_s24, %s437_s24 }
   0xc   :  { %p444_p6 = por %p443_p5, %p442_p4 }
   0xe   :  { %p445_p7 = pnand %p444_p6, %p438_p3 }
  0x10   :  { %448 = shalt.err (!%p445_p7)
}
  0x11   :  { %s500_s25 = smov 128   ;;  %s501_s26 = smov 8  }
  0x12   :  { %23 = dma.hbm_to_vmem [thread:$0]  %s580_s0, 256, %s18_s16, [#allocation3], %s500_s25, %s500_s25, %s501_s26  }
  0x13   :  { %s502_s29 = smov [#allocation5]   ;;  %s449_s7 = scalar_lea.hbm %s581_s1, 2048 }
  0x14   :  { %s29_s30 = sshll.u32 %s502_s29, 4  ;;  %p450_p8 = scmp.ne.s32.totalorder %s581_s1, %s449_s7  ;;  %s30_s30 = int_to_ptr.vmem [resolvable:$true] %s29_s30 }
  0x15   :  { %p453_p9 = scmp.lt.u32.totalorder %s449_s7, %s581_s1 }
  0x17   :  { %p455_p10 = pnand %p453_p9, %p450_p8 }
  0x19   :  { %458 = shalt.err (!%p455_p10)
}
  0x1a   :  { %s459_s12 = scalar_lea.vmem %s30_s30, 2048  ;;  %p464_p12 = scmp.lt.s32.totalorder %s30_s30, %s30_s30 }
  0x1b   :  { %p460_p11 = scmp.ne.s32.totalorder %s30_s30, %s459_s12  ;;  %p465_p13 = scmp.lt.s32.totalorder %s459_s12, %s459_s12 }
  0x1d   :  { %p466_p0 = por %p465_p13, %p464_p12 }
  0x1f   :  { %p467_p1 = pnand %p466_p0, %p460_p11 }
  0x21   :  { %470 = shalt.err (!%p467_p1)
}
  0x22   :  { %35 = dma.hbm_to_vmem [thread:$0]  %s581_s1, 2048, %s30_s30, [#allocation6], %s500_s25, %s500_s25, %s501_s26  }
  0x23   :  { %493 = dma.done.wait [#allocation3], 256  }
  0x24   :  { %494 = vsyncadd [#allocation3], 4294967040 }
  0x25   :  { %495 = dma.done.wait [#allocation6], 2048  }
  0x26   :  { %496 = vsyncadd [#allocation6], 4294965248  ;;  %v48_v0 = vld [vmem:[#allocation5] sm:$0xff]  ;;  %v49_v1 = vld [vmem:[#allocation5 + $0x8] sm:$0xff]  ;;  %s503_s17 = smov [#allocation7]  }
  0x27   :  { %v50_v2 = vld [vmem:[#allocation5 + $0x10] sm:$0xff]  ;;  %v358_v3 = vpack.c.bf16 %v49_v1, %v48_v0  ;;  %v51_v4 = vld [vmem:[#allocation5 + $0x18] sm:$0xff]  ;;  %v52_v6 = vld [vmem:[#allocation5 + $0x20] sm:$0xff]  ;;  %s237_s18 = sshll.u32 %s503_s17, 4  ;;  %s238_s18 = int_to_ptr.vmem [resolvable:$true] %s237_s18 }
  0x28   :  { %v362_v5 = vpack.c.bf16 %v51_v4, %v50_v2  ;;  %v53_v7 = vld [vmem:[#allocation5 + $0x28] sm:$0xff]  ;;  %v46_v8 = vld [vmem:[#allocation2] sm:$0xff]  ;;  %v55_v11 = vld [vmem:[#allocation5 + $0x38] sm:$0xff]  ;;  %p476_p3 = scmp.lt.s32.totalorder %s238_s18, %s238_s18 }
  0x29   :  { %359 = vmatprep.subr.bf16.mxu0 %v358_v3  ;;  %391 = vmatprep.subr.bf16.mxu1 %v358_v3  ;;  %v366_v9 = vpack.c.bf16 %v53_v7, %v52_v6  ;;  %v54_v10 = vld [vmem:[#allocation5 + $0x30] sm:$0xff]  ;;  %v56_v13 = vld [vmem:[#allocation5 + $0x40] sm:$0xff]  ;;  %v57_v14 = vld [vmem:[#allocation5 + $0x48] sm:$0xff] }
  0x2a   :  { %361 = vmatpush3.bf16.xpose.msra.mxu0 %v358_v3  ;;  %393 = vmatpush3.bf16.msra.mxu1 %v358_v3  ;;  %v370_v12 = vpack.c.bf16 %v55_v11, %v54_v10  ;;  %v374_v15 = vpack.c.bf16 %v57_v14, %v56_v13  ;;  %v58_v16 = vld [vmem:[#allocation5 + $0x50] sm:$0xff]  ;;  %v59_v17 = vld [vmem:[#allocation5 + $0x58] sm:$0xff]  ;;  %v60_v19 = vld [vmem:[#allocation5 + $0x60] sm:$0xff] }
  0x2b   :  { %363 = vmatprep.subr.bf16.mxu0 %v362_v5  ;;  %395 = vmatprep.subr.bf16.mxu1 %v362_v5  ;;  %v378_v18 = vpack.c.bf16 %v59_v17, %v58_v16  ;;  %v61_v20 = vld [vmem:[#allocation5 + $0x68] sm:$0xff]  ;;  %v62_v22 = vld [vmem:[#allocation5 + $0x70] sm:$0xff]  ;;  %v63_v23 = vld [vmem:[#allocation5 + $0x78] sm:$0xff] }
  0x2c   :  { %320 = vmatprep.mubr.f32.mxu0 %v46_v8  ;;  %v382_v21 = vpack.c.bf16 %v61_v20, %v60_v19  ;;  %v386_v24 = vpack.c.bf16 %v63_v23, %v62_v22  ;;  %v47_v25 = vld [vmem:[#allocation2 + $0x8] sm:$0xff]  ;;  %v250_v26 = vld [vmem:[%s582_s2] ss:$0 sm:$0xff]  ;;  %s471_s2 = scalar_lea.vmem %s238_s18, 256 }
  0x2d   :  { %v251_v33 = vld [vmem:[%s583_s3] ss:$0 sm:$0xff]  ;;  %p472_p2 = scmp.ne.s32.totalorder %s238_s18, %s471_s2  ;;  %p477_p4 = scmp.lt.s32.totalorder %s471_s2, %s471_s2 }
  0x2e   :  { %397 = vmatpush3.bf16.msra.mxu1 %v362_v5 }
  0x2f   :  { %399 = vmatprep.subr.bf16.mxu1 %v366_v9  ;;  %p478_p5 = por %p477_p4, %p476_p3 }
  0x31   :  { %p479_p6 = pnand %p478_p5, %p472_p2 }
  0x32   :  { %365 = vmatpush3.bf16.xpose.msra.mxu0 %v362_v5  ;;  %401 = vmatpush3.bf16.msra.mxu1 %v366_v9 }
  0x33   :  { %367 = vmatprep.subr.bf16.mxu0 %v366_v9  ;;  %403 = vmatprep.subr.bf16.mxu1 %v370_v12 }
  0x36   :  { %405 = vmatpush3.bf16.msra.mxu1 %v370_v12 }
  0x37   :  { %407 = vmatprep.subr.bf16.mxu1 %v374_v15 }
  0x3a   :  { %369 = vmatpush3.bf16.xpose.msra.mxu0 %v366_v9  ;;  %409 = vmatpush3.bf16.msra.mxu1 %v374_v15 }
  0x3b   :  { %371 = vmatprep.subr.bf16.mxu0 %v370_v12  ;;  %411 = vmatprep.subr.bf16.mxu1 %v378_v18 }
  0x3e   :  { %413 = vmatpush3.bf16.msra.mxu1 %v378_v18 }
  0x3f   :  { %415 = vmatprep.subr.bf16.mxu1 %v382_v21 }
  0x42   :  { %373 = vmatpush3.bf16.xpose.msra.mxu0 %v370_v12  ;;  %417 = vmatpush3.bf16.msra.mxu1 %v382_v21 }
  0x43   :  { %375 = vmatprep.subr.bf16.mxu0 %v374_v15  ;;  %419 = vmatprep.subr.bf16.mxu1 %v386_v24 }
  0x46   :  { %421 = vmatpush3.bf16.msra.mxu1 %v386_v24 }
  0x4a   :  { %377 = vmatpush3.bf16.xpose.msra.mxu0 %v374_v15 }
  0x4b   :  { %379 = vmatprep.subr.bf16.mxu0 %v378_v18 }
  0x52   :  { %381 = vmatpush3.bf16.xpose.msra.mxu0 %v378_v18 }
  0x53   :  { %383 = vmatprep.subr.bf16.mxu0 %v382_v21 }
  0x5a   :  { %385 = vmatpush3.bf16.xpose.msra.mxu0 %v382_v21 }
  0x5b   :  { %387 = vmatprep.subr.bf16.mxu0 %v386_v24 }
  0x62   :  { %389 = vmatpush3.bf16.xpose.msra.mxu0 %v386_v24 }
  0x69   :  { %321 = vmatmul.mubr.f32.vlgmr.msra.gmra.mrb[0].mxu0 %v47_v25 }
 0x13c   :  { %v322_v27 = vpop.f32.mrb[0].mxu0 }
 0x13d   :  { %v143_v28 = vadd.f32 %v322_v27, %v250_v26  ;;  %v137_v29 = vpop.f32.mrb[1].mxu0 }
 0x13e   :  { %v138_v30 = vadd.f32 %v250_v26, %v137_v29 }
 0x13f   :  { %v147_v32 = vmax.f32 %v143_v28, 0.0 }
 0x140   :  { %v146_v31 = vmax.f32 %v138_v30, 0.0 }
 0x142   :  { %355 = vmatprep.mubr.f32.mxu1 %v146_v31 }
 0x143   :  { %356 = vmatmul.mubr.f32.vlgmr.msra.gmra.mrb[0].mxu1 %v147_v32 }
 0x216   :  { %v357_v34 = vpop.f32.mrb[0].mxu1 }
 0x217   :  { %v227_v35 = vadd.f32 %v357_v34, %v251_v33  ;;  %v221_v36 = vpop.f32.mrb[1].mxu1 }
 0x218   :  { %v222_v37 = vadd.f32 %v251_v33, %v221_v36 }
 0x219   :  { %231 = vst [vmem:[#allocation7 + $0x8] sm:$0xff] %v227_v35 }
 0x21a   :  { %230 = vst [vmem:[#allocation7] sm:$0xff] %v222_v37 }
 0x21b   :  { %482 = shalt.err (!%p479_p6)
}
 0x21c   :  { %s483_s3 = scalar_lea.hbm %s584_s4, 256 }
 0x21d   :  { %p484_p7 = scmp.ne.s32.totalorder %s584_s4, %s483_s3  ;;  %p487_p8 = scmp.lt.u32.totalorder %s483_s3, %s584_s4 }
 0x21f   :  { %p489_p9 = pnand %p487_p8, %p484_p7 }
 0x221   :  { %492 = shalt.err (!%p489_p9)
}
 0x222   :  { %243 = dma.vmem_to_hbm [thread:$0]  %s238_s18, 256, %s584_s4, [#allocation4], %s500_s25, %s500_s25, %s501_s26  }
 0x223   :  { %497 = dma.done.wait [#allocation4], 256  }
 0x224   :  { %498 = vsyncadd [#allocation4], 4294967040 }
 0x225   :  { %247 = vsyncpa [#allocation3], 1 }
 0x226   :  { %248 = vsyncpa [#allocation6], 1 }
 0x227   :  { %249 = vsyncpa [#allocation4], 1 }

</bundles_post_ra>
